<compile_context>
chip_gen: v7x
topology: tpu7x:2x2x1
jax: 0.10.0
libtpu: 0.0.40
codegen_flags: <defaults>
</compile_context>

<pallas_src>
import functools

import jax
import jax.numpy as jnp
from jax.experimental import pallas as pl
from jax.experimental.pallas import tpu as pltpu


def _normalize_kernel(x_ref, alpha_ref, bias_ref, o_ref, *, eps, hidden):
    # x_ref: (row_tile, H); alpha_ref / bias_ref: (1, H)
    x = x_ref[...].astype(jnp.float32)
    h = float(hidden)

    # Fused single-sweep reductions: two independent XLU reductions instead of
    # two dependent passes (mean, then sum((x - mean)^2)).
    s1 = jnp.sum(x, axis=-1, keepdims=True)
    s2 = jnp.sum(x * x, axis=-1, keepdims=True)
    mean = s1 * (1.0 / h)
    # PyTorch x.std(dim=-1) is unbiased (divide by n-1).  Guard h == 1 and
    # clamp tiny negatives from cancellation before the sqrt.
    var = jnp.maximum((s2 - h * (mean * mean)) / max(h - 1.0, 1.0), 0.0)
    std = jnp.sqrt(var)

    # eps is added to std (NOT var) to match the PyTorch module exactly.
    denom = std + eps
    # Approximate reciprocal of the tiny (row_tile, 1) operand runs on the EUP
    # slot; one Newton step restores ~full f32 precision so the full-tile op
    # below becomes a cheap VPU multiply instead of a divide.
    r = pl.reciprocal(denom, approx=True)
    inv = r * (2.0 - denom * r)

    alpha = alpha_ref[...].astype(jnp.float32)  # (1, H) - broadcast stays implicit
    bias = bias_ref[...].astype(jnp.float32)    # (1, H)

    centered = x - mean
    o_ref[...] = ((centered * inv) * alpha + bias).astype(o_ref.dtype)


def _round_up(x, m):
    return (x + m - 1) // m * m


def _vmem_capacity_bytes():
    try:
        return int(pltpu.get_tpu_info().vmem_capacity_bytes)
    except Exception:
        return 64 << 20  # conservative fallback (v7x per-TensorCore VMEM)


def _pick_row_tile(rows, h, in_bytes, out_bytes, vmem_capacity):
    # Per grid step, BlockSpec double-buffers the input and the output block:
    #   vmem ~= 2 * row_tile * H * (in_bytes + out_bytes)
    # Keep that under ~45% of physical VMEM so full 2-deep pipelining survives
    # on every generation (v7x: 64 MiB, v5e/v6e: 128 MiB).
    budget = int(0.45 * vmem_capacity)
    per_row = 2 * h * (in_bytes + out_bytes)
    cap = (budget // max(per_row, 1)) // 8 * 8
    cap = max(8, min(1024, cap))
    return min(cap, max(8, _round_up(rows, 8)))


def normalize(x, alpha, bias, eps=1e-6, *, row_tile=None):
    """x: (..., H); alpha, bias: (H,). Returns same shape/dtype as x."""
    orig_shape = x.shape
    h = orig_shape[-1]
    x2 = x.reshape(-1, h)
    rows = x2.shape[0]

    in_bytes = x2.dtype.itemsize
    out_bytes = x2.dtype.itemsize
    vmem_capacity = _vmem_capacity_bytes()

    if row_tile is None:
        row_tile = _pick_row_tile(rows, h, in_bytes, out_bytes, vmem_capacity)

    # Pad rows up to a multiple of the tile instead of asserting divisibility.
    # Padded zero-rows produce `bias` in the padded region and are sliced off.
    rows_padded = _round_up(rows, row_tile)
    if rows_padded != rows:
        x2 = jnp.pad(x2, ((0, rows_padded - rows), (0, 0)))

    alpha2 = alpha.reshape(1, h)
    bias2 = bias.reshape(1, h)

    grid = (rows_padded // row_tile,)

    # Scoped VMEM: cover the double-buffered blocks with headroom, bounded by
    # the physical capacity of the current generation (v5e's default scoped
    # limit is only 16 MiB, so this must be raised explicitly).
    per_step = 2 * row_tile * h * (in_bytes + out_bytes) + 2 * h * 8
    vmem_limit = int(min(0.8 * vmem_capacity, max(32 << 20, 2 * per_step)))

    # TODO(synk): for H < 128 a lane-dense repack (rows on the 128-lane axis)
    # would avoid masked vst.msk partial stores; moot for typical H >= 512.

    kernel = functools.partial(_normalize_kernel, eps=eps, hidden=h)

    out = pl.pallas_call(
        kernel,
        out_shape=jax.ShapeDtypeStruct((rows_padded, h), x.dtype),
        grid_spec=pltpu.PrefetchScalarGridSpec(
            num_scalar_prefetch=0,
            grid=grid,
            in_specs=[
                pl.BlockSpec((row_tile, h), lambda i: (i, 0)),
                pl.BlockSpec((1, h), lambda i: (0, 0)),
                pl.BlockSpec((1, h), lambda i: (0, 0)),
            ],
            out_specs=pl.BlockSpec((row_tile, h), lambda i: (i, 0)),
        ),
        compiler_params=pltpu.CompilerParams(
            dimension_semantics=("parallel",),
            vmem_limit_bytes=vmem_limit,
        ),
    )(x2, alpha2, bias2)

    if rows_padded != rows:
        out = out[:rows]
    return out.reshape(orig_shape)


if __name__ == "__main__":
    key = jax.random.PRNGKey(0)
    batch, seq, hidden = 2, 8, 32

    x = jax.random.normal(key, (batch, seq, hidden), dtype=jnp.float32)

    # Deterministic parameter init matching nn.Parameter(torch.ones/zeros(size))
    alpha = jnp.ones((hidden,), dtype=jnp.float32)
    bias = jnp.zeros((hidden,), dtype=jnp.float32)

    out = normalize(x, alpha, bias, eps=1e-6)
    jax.block_until_ready(out)

    # Reference check in plain JAX (PyTorch semantics: unbiased std, eps on std)
    mean = jnp.mean(x, axis=-1, keepdims=True)
    std = jnp.sqrt(jnp.sum((x - mean) ** 2, axis=-1, keepdims=True) / (hidden - 1))
    ref = alpha * (x - mean) / (std + 1e-6) + bias
    assert jnp.allclose(out, ref, atol=1e-5, rtol=1e-5)

    print("KERNEL_OK")
</pallas_src>

<mosaic_0001>
module attributes {stable_mosaic.version = 11 : i64} {
  func.func @_normalize_kernel(%arg0: i32, %arg1: memref<16x32xf32, #tpu.memory_space<vmem>>, %arg2: memref<1x32xf32, #tpu.memory_space<vmem>>, %arg3: memref<1x32xf32, #tpu.memory_space<vmem>>, %arg4: memref<16x32xf32, #tpu.memory_space<vmem>>) attributes {dimension_semantics = [#tpu.dimension_semantics<parallel>], iteration_bounds = array<i64: 1>, scalar_prefetch = 0 : i64, scratch_operands = 0 : i64, tpu.core_type = #tpu.core_type<tc>, window_params = [{transform_indices = @transform_0, window_bounds = array<i64: 16, 32>}, {pipeline_mode = #tpu.pipeline_mode<synchronous>, transform_indices = @transform_1, window_bounds = array<i64: 1, 32>}, {pipeline_mode = #tpu.pipeline_mode<synchronous>, transform_indices = @transform_2, window_bounds = array<i64: 1, 32>}, {transform_indices = @transform_3, window_bounds = array<i64: 16, 32>}]} {
    %c0 = arith.constant 0 : index
    %c0_0 = arith.constant 0 : index
    %0 = vector.load %arg1[%c0, %c0_0] : memref<16x32xf32, #tpu.memory_space<vmem>>, vector<16x32xf32>
    %cst = arith.constant dense<0.000000e+00> : vector<16xf32>
    %1 = vector.multi_reduction <add>, %0, %cst [1] : vector<16x32xf32> to vector<16xf32>
    %2 = vector.shape_cast %1 : vector<16xf32> to vector<16x1xf32>
    %3 = arith.mulf %0, %0 : vector<16x32xf32>
    %cst_1 = arith.constant dense<0.000000e+00> : vector<16xf32>
    %4 = vector.multi_reduction <add>, %3, %cst_1 [1] : vector<16x32xf32> to vector<16xf32>
    %5 = vector.shape_cast %4 : vector<16xf32> to vector<16x1xf32>
    %cst_2 = arith.constant 3.125000e-02 : f32
    %6 = vector.broadcast %cst_2 : f32 to vector<16x1xf32>
    %7 = arith.mulf %2, %6 : vector<16x1xf32>
    %8 = arith.mulf %7, %7 : vector<16x1xf32>
    %cst_3 = arith.constant 3.200000e+01 : f32
    %9 = vector.broadcast %cst_3 : f32 to vector<16x1xf32>
    %10 = arith.mulf %9, %8 : vector<16x1xf32>
    %11 = arith.subf %5, %10 : vector<16x1xf32>
    %cst_4 = arith.constant 3.100000e+01 : f32
    %12 = vector.broadcast %cst_4 : f32 to vector<16x1xf32>
    %13 = arith.divf %11, %12 : vector<16x1xf32>
    %cst_5 = arith.constant 0.000000e+00 : f32
    %14 = vector.broadcast %cst_5 : f32 to vector<16x1xf32>
    %15 = arith.maximumf %13, %14 : vector<16x1xf32>
    %16 = math.sqrt %15 : vector<16x1xf32>
    %cst_6 = arith.constant 9.99999997E-7 : f32
    %17 = vector.broadcast %cst_6 : f32 to vector<16x1xf32>
    %18 = arith.addf %16, %17 : vector<16x1xf32>
    %19 = tpu.reciprocal %18 {approx = true} : vector<16x1xf32> -> vector<16x1xf32>
    %20 = arith.mulf %18, %19 : vector<16x1xf32>
    %cst_7 = arith.constant 2.000000e+00 : f32
    %21 = vector.broadcast %cst_7 : f32 to vector<16x1xf32>
    %22 = arith.subf %21, %20 : vector<16x1xf32>
    %23 = arith.mulf %19, %22 : vector<16x1xf32>
    %c0_8 = arith.constant 0 : index
    %c0_9 = arith.constant 0 : index
    %24 = vector.load %arg2[%c0_8, %c0_9] : memref<1x32xf32, #tpu.memory_space<vmem>>, vector<1x32xf32>
    %c0_10 = arith.constant 0 : index
    %c0_11 = arith.constant 0 : index
    %25 = vector.load %arg3[%c0_10, %c0_11] : memref<1x32xf32, #tpu.memory_space<vmem>>, vector<1x32xf32>
    %26 = vector.broadcast %7 : vector<16x1xf32> to vector<16x32xf32>
    %27 = arith.subf %0, %26 : vector<16x32xf32>
    %28 = vector.broadcast %23 : vector<16x1xf32> to vector<16x32xf32>
    %29 = arith.mulf %27, %28 : vector<16x32xf32>
    %30 = vector.broadcast %24 : vector<1x32xf32> to vector<16x32xf32>
    %31 = arith.mulf %29, %30 : vector<16x32xf32>
    %32 = vector.broadcast %25 : vector<1x32xf32> to vector<16x32xf32>
    %33 = arith.addf %31, %32 : vector<16x32xf32>
    %c0_12 = arith.constant 0 : index
    %c0_13 = arith.constant 0 : index
    %34 = vector.load %arg4[%c0_12, %c0_13] : memref<16x32xf32, #tpu.memory_space<vmem>>, vector<16x32xf32>
    tpu.vector_store %arg4[%c0_12, %c0_13], %33 {strides = array<i32>} : memref<16x32xf32, #tpu.memory_space<vmem>>, vector<16x32xf32>,
    return
  }
  func.func @transform_0(%arg0: i32) -> (i32, i32) {
    %c0_i32 = arith.constant 0 : i32
    %c0_i32_0 = arith.constant 0 : i32
    return %arg0, %c0_i32 : i32, i32
  }
  func.func @transform_1(%arg0: i32) -> (i32, i32) {
    %c0_i32 = arith.constant 0 : i32
    %c0_i32_0 = arith.constant 0 : i32
    %c0_i32_1 = arith.constant 0 : i32
    return %c0_i32, %c0_i32_0 : i32, i32
  }
  func.func @transform_2(%arg0: i32) -> (i32, i32) {
    %c0_i32 = arith.constant 0 : i32
    %c0_i32_0 = arith.constant 0 : i32
    %c0_i32_1 = arith.constant 0 : i32
    return %c0_i32, %c0_i32_0 : i32, i32
  }
  func.func @transform_3(%arg0: i32) -> (i32, i32) {
    %c0_i32 = arith.constant 0 : i32
    %c0_i32_0 = arith.constant 0 : i32
    return %arg0, %c0_i32 : i32, i32
  }
}

</mosaic_0001>

<bundles_post_ra>
// kernel: tpu_custom_call.1
= control target key start
LH: loop header
LB: loop body
LE: loop exit
PB: predicated region body
PF: predicated region fallthrough
CT: control target
= control target key end

     0   :  { %8 = vsyncpa [#allocation3], 0  ;;  %s258_s0 = inlined_call_operand.hbm [shape: f32[16,32], index: 0, kind: input, shape index: {}]   ;;  %s259_s1 = inlined_call_operand.vmem [shape: f32[1,32], index: 1, kind: input, shape index: {}]   ;;  %s260_s2 = inlined_call_operand.vmem [shape: f32[1,32], index: 2, kind: input, shape index: {}]   ;;  %s261_s3 = inlined_call_operand.hbm [shape: f32[16,32], index: 3, kind: output, shape index: {}]  }
   0x1   :  { %9 = vsyncpa [#allocation4], 0  ;;  %s186_s12 = smov [#allocation2]   ;;  %s138_s16 = scalar_lea.hbm %s258_s0, 256 }
   0x2   :  { %s15_s13 = sshll.u32 %s186_s12, 4  ;;  %p139_p0 = scmp.ne.s32.totalorder %s258_s0, %s138_s16  ;;  %s16_s13 = int_to_ptr.vmem [resolvable:$true] %s15_s13 }
   0x3   :  { %p142_p1 = scmp.lt.u32.totalorder %s138_s16, %s258_s0 }
   0x5   :  { %p144_p2 = pnand %p142_p1, %p139_p0 }
   0x7   :  { %147 = shalt.err (!%p144_p2)
}
   0x8   :  { %s148_s21 = scalar_lea.vmem %s16_s13, 256  ;;  %p153_p4 = scmp.lt.s32.totalorder %s16_s13, %s16_s13 }
   0x9   :  { %p149_p3 = scmp.ne.s32.totalorder %s16_s13, %s148_s21  ;;  %p154_p5 = scmp.lt.s32.totalorder %s148_s21, %s148_s21 }
   0xb   :  { %p155_p6 = por %p154_p5, %p153_p4 }
   0xd   :  { %p156_p7 = pnand %p155_p6, %p149_p3 }
   0xf   :  { %159 = shalt.err (!%p156_p7)
}
  0x10   :  { %s187_s22 = smov 128   ;;  %s188_s23 = smov 8  }
  0x11   :  { %21 = dma.hbm_to_vmem [thread:$0]  %s258_s0, 256, %s16_s13, [#allocation3], %s187_s22, %s187_s22, %s188_s23  }
  0x12   :  { %182 = dma.done.wait [#allocation3], 256  }
  0x13   :  { %183 = vsyncadd [#allocation3], 4294967040  ;;  %vm31_vm0 = vcmask 261120   ;;  %v29_v0 = vld [vmem:[#allocation2] sm:$0xff]  ;;  %v225_v1 = vld [vmem:[#allocation2 + $0x8] sm:$0xff]  ;;  %s189_s29 = smov [#allocation5]  }
  0x14   :  { %v32_v2 = vsel %vm31_vm0, %v29_v0, 0.0  ;;  %v38_v3 = vmul.f32 %v29_v0, %v29_v0  ;;  %v39_v4 = vmul.f32 %v225_v1, %v225_v1  ;;  %v35_v5 = vsel %vm31_vm0, %v225_v1, 0.0  ;;  %v124_v43 = vld [vmem:[%s259_s1] ss:$0 sm:$0xff]  ;;  %s112_s30 = sshll.u32 %s189_s29, 4  ;;  %s113_s30 = int_to_ptr.vmem [resolvable:$true] %s112_s30 }
  0x15   :  { %33 = vadd.xlane.f32.xlu0 %v32_v2  ;;  %v125_v46 = vld [vmem:[%s260_s2] ss:$0 sm:$0xff]  ;;  %s160_s1 = scalar_lea.vmem %s113_s30, 256  ;;  %p165_p9 = scmp.lt.s32.totalorder %s113_s30, %s113_s30 }
  0x16   :  { %v40_v6 = vsel %vm31_vm0, %v38_v3, 0.0  ;;  %v43_v7 = vsel %vm31_vm0, %v39_v4, 0.0  ;;  %p161_p8 = scmp.ne.s32.totalorder %s113_s30, %s160_s1  ;;  %p166_p10 = scmp.lt.s32.totalorder %s160_s1, %s160_s1 }
  0x17   :  { %41 = vadd.xlane.f32.xlu1 %v40_v6 }
  0x18   :  { %p167_p11 = por %p166_p10, %p165_p9 }
  0x19   :  { %36 = vadd.xlane.f32.xlu0 %v35_v5 }
  0x1a   :  { %p168_p12 = pnand %p167_p11, %p161_p8 }
  0x1b   :  { %44 = vadd.xlane.f32.xlu1 %v43_v7 }
  0xa2   :  { %v34_v8 = vpop.xlane.xlu0 %33 }
  0xa3   :  { %v46_v9 = vmul.f32 0.03125, %v34_v8 }
  0xa4   :  { %v42_v10 = vpop.xlane.xlu1 %41 }
  0xa5   :  { %v48_v11 = vmul.f32 %v46_v9, %v46_v9  ;;  %v85_v40 = vsub.f32 %v29_v0, %v46_v9 }
  0xa6   :  { %v37_v12 = vpop.xlane.xlu0 %36 }
  0xa7   :  { %v47_v13 = vmul.f32 0.03125, %v37_v12  ;;  %v50_v14 = vmul.f32 32.0, %v48_v11 }
  0xa8   :  { %v45_v17 = vpop.xlane.xlu1 %44 }
  0xa9   :  { %v49_v15 = vmul.f32 %v47_v13, %v47_v13  ;;  %v52_v16 = vsub.f32 %v42_v10, %v50_v14  ;;  %v86_v48 = vsub.f32 %v225_v1, %v47_v13 }
  0xab   :  { %v51_v18 = vmul.f32 32.0, %v49_v15  ;;  %v55_v19 = vmul.f32 0.032258064, %v52_v16 }
  0xad   :  { %v57_v20 = vmax.f32 %v55_v19, 0.0  ;;  %v53_v21 = vsub.f32 %v45_v17, %v51_v18 }
  0xaf   :  { %130 = vrsqrt.f32 %v57_v20  ;;  %v56_v22 = vmul.f32 0.032258064, %v53_v21  ;;  %vm61_vm1 = vcmp.eq.f32.partialorder %v57_v20, inf  ;;  %v64_v26 = vand.u32 2147483648, %v57_v20 }
  0xb0   :  { %vm63_vm2 = vcmp.eq.f32.partialorder %v57_v20, 0.0 }
  0xb1   :  { %v58_v23 = vmax.f32 %v56_v22, 0.0 }
  0xb3   :  { %132 = vrsqrt.f32 %v58_v23  ;;  %vm68_vm3 = vcmp.eq.f32.partialorder %v58_v23, inf  ;;  %v71_v32 = vand.u32 2147483648, %v58_v23  ;;  %vm70_vm4 = vcmp.eq.f32.partialorder %v58_v23, 0.0 }
  0xb9   :  { %v131_v24 = vpop.eup %130 }
  0xba   :  { %v60_v25 = vmul.f32 %v131_v24, %v57_v20 }
  0xbc   :  { %v62_v27 = vsel %vm61_vm1, %v57_v20, %v60_v25 }
  0xbd   :  { %v65_v28 = vsel %vm63_vm2, %v64_v26, %v62_v27  ;;  %v133_v29 = vpop.eup %132 }
  0xbe   :  { %v73_v30 = vadd.f32 1e-06, %v65_v28  ;;  %v67_v31 = vmul.f32 %v133_v29, %v58_v23 }
  0xc0   :  { %134 = vrcp.f32 %v73_v30  ;;  %v69_v33 = vsel %vm68_vm3, %v58_v23, %v67_v31 }
  0xc1   :  { %v72_v34 = vsel %vm70_vm4, %v71_v32, %v69_v33 }
  0xc2   :  { %v74_v35 = vadd.f32 1e-06, %v72_v34 }
  0xc4   :  { %136 = vrcp.f32 %v74_v35 }
  0xca   :  { %v135_v36 = vpop.eup %134 }
  0xcb   :  { %v77_v37 = vmul.f32 %v135_v36, %v73_v30 }
  0xcd   :  { %v79_v38 = vsub.f32 2.0, %v77_v37 }
  0xce   :  { %v137_v39 = vpop.eup %136 }
  0xcf   :  { %v81_v41 = vmul.f32 %v135_v36, %v79_v38  ;;  %v78_v42 = vmul.f32 %v137_v39, %v74_v35 }
  0xd1   :  { %v87_v44 = vmul.f32 %v85_v40, %v81_v41  ;;  %v80_v45 = vsub.f32 2.0, %v78_v42 }
  0xd3   :  { %v95_v47 = vmul.f32 %v124_v43, %v87_v44  ;;  %v82_v49 = vmul.f32 %v137_v39, %v80_v45 }
  0xd5   :  { %v103_v50 = vadd.f32 %v125_v46, %v95_v47  ;;  %v88_v51 = vmul.f32 %v86_v48, %v82_v49 }
  0xd7   :  { %105 = vst.msk [vmem:[#allocation5] sm:$0xff] %vm31_vm0, %v103_v50  ;;  %v96_v52 = vmul.f32 %v124_v43, %v88_v51 }
  0xd9   :  { %v104_v53 = vadd.f32 %v125_v46, %v96_v52 }
  0xdb   :  { %106 = vst.msk [vmem:[#allocation5 + $0x8] sm:$0xff] %vm31_vm0, %v104_v53 }
  0xdc   :  { %171 = shalt.err (!%p168_p12)
}
  0xdd   :  { %s172_s5 = scalar_lea.hbm %s261_s3, 256 }
  0xde   :  { %p173_p13 = scmp.ne.s32.totalorder %s261_s3, %s172_s5  ;;  %p176_p0 = scmp.lt.u32.totalorder %s172_s5, %s261_s3 }
  0xe0   :  { %p178_p1 = pnand %p176_p0, %p173_p13 }
  0xe2   :  { %181 = shalt.err (!%p178_p1)
}
  0xe3   :  { %118 = dma.vmem_to_hbm [thread:$0]  %s113_s30, 256, %s261_s3, [#allocation4], %s187_s22, %s187_s22, %s188_s23  }
  0xe4   :  { %184 = dma.done.wait [#allocation4], 256  }
  0xe5   :  { %185 = vsyncadd [#allocation4], 4294967040 }
  0xe6   :  { %122 = vsyncpa [#allocation3], 1 }
  0xe7   :  { %123 = vsyncpa [#allocation4], 1 }

</bundles_post_ra>
